<compile_context>
chip_gen: v7x
topology: tpu7x:2x2x1
jax: 0.10.0
libtpu: 0.0.40
codegen_flags: <defaults>
</compile_context>

<pallas_src>
import jax
import jax.numpy as jnp
from jax.experimental import pallas as pl
from jax.experimental.pallas import tpu as pltpu

# ---- problem sizes (small, consistent with the module) ----
B = 2            # batch
N = 8            # sequence length (T*H*W tokens)
DIM = 32         # channels
DIM_OUT = 32     # output channels
NUM_HEADS = 2
HEAD_DIM = DIM_OUT // NUM_HEADS
MLP_RATIO = 4
HIDDEN = DIM * MLP_RATIO
SCALE = HEAD_DIM ** -0.5
EPS = 1e-6
BN = B * N
LANE = 128       # lane width of the packed parameter slab


def _layernorm(x, w, b):
    mu = jnp.mean(x, axis=-1, keepdims=True)
    var = jnp.mean((x - mu) * (x - mu), axis=-1, keepdims=True)
    return (x - mu) * jax.lax.rsqrt(var + EPS) * w + b


def _reversible_block_kernel(x_ref, p_ref, wqkv_ref, wproj_ref, w1_ref, w2_ref, y_ref):
    # Whole problem in one grid step: tokens of all batches stacked on the sublane axis,
    # x1 and x2 side by side on the lane axis.
    x = x_ref[...].astype(jnp.float32)                  # (BN, 2*DIM)
    x1 = x[:, 0:DIM]
    x2 = x[:, DIM:2 * DIM]

    # Packed parameter slab (8, 128): one DMA for every small vector parameter.
    ln1_w = p_ref[0:1, 0:DIM]
    ln1_b = p_ref[1:2, 0:DIM]
    b_qkv = p_ref[2:3, 0:3 * DIM_OUT]
    b_prj = p_ref[3:4, 0:DIM_OUT]
    ln2_w = p_ref[4:5, 0:DIM]
    ln2_b = p_ref[5:6, 0:DIM]
    b1 = p_ref[6:7, 0:HIDDEN]
    b2 = p_ref[7:8, 0:DIM]

    # ---------------- F: pre-LayerNorm + MultiScaleAttention ----------------
    xn = _layernorm(x2, ln1_w, ln1_b)                   # (BN, DIM)

    # Fused qkv projection: one (BN,32)@(32,96) MXU dot; lane layout matches the
    # PyTorch reshape(B,N,3,H,hd): q | k | v along lanes, heads contiguous inside each.
    qkv = jnp.dot(xn, wqkv_ref[...], preferred_element_type=jnp.float32) + b_qkv
    q = qkv[:, 0:DIM_OUT]
    k = qkv[:, DIM_OUT:2 * DIM_OUT]
    v = qkv[:, 2 * DIM_OUT:3 * DIM_OUT]

    o_heads = []
    for h in range(NUM_HEADS):                          # unrolled, NUM_HEADS=2
        sl = slice(h * HEAD_DIM, (h + 1) * HEAD_DIM)
        qh = q[:, sl].reshape(B, N, HEAD_DIM)
        kh = k[:, sl].reshape(B, N, HEAD_DIM)
        vh = v[:, sl].reshape(B, N, HEAD_DIM)

        # Batched over B so tokens never attend across batch elements.
        s = jnp.einsum('bnd,bmd->bnm', qh * SCALE, kh,
                       preferred_element_type=jnp.float32)          # (B, N, N)
        s = s - jnp.max(s, axis=-1, keepdims=True)
        p = jnp.exp(s)
        p = p / jnp.sum(p, axis=-1, keepdims=True)      # exact softmax normalization

        oh = jnp.einsum('bnm,bmd->bnd', p, vh,
                        preferred_element_type=jnp.float32) + qh     # residual pooling (+q)
        o_heads.append(oh)

    # One lane-concat of the two 16-lane head outputs -> single output-projection dot.
    o = jnp.concatenate(o_heads, axis=-1).reshape(BN, DIM_OUT)
    f_x2 = jnp.dot(o, wproj_ref[...], preferred_element_type=jnp.float32) + b_prj
    # TODO(synk): attention dropout (cfg.MVIT.DROPOUT_RATE) and drop_path omitted — both 0.0.

    y1 = x1 + f_x2

    # ---------------- G: pre-LayerNorm + MLP ----------------
    yn = _layernorm(y1, ln2_w, ln2_b)
    hid = jnp.dot(yn, w1_ref[...], preferred_element_type=jnp.float32) + b1
    # TODO(synk): nn.GELU default is exact erf-GELU; tanh approximation used in-kernel.
    hid = jax.nn.gelu(hid, approximate=True)
    g_y1 = jnp.dot(hid, w2_ref[...], preferred_element_type=jnp.float32) + b2
    y2 = x2 + g_y1

    # Single lane-dense (BN, 64) store: one writeback DMA for y1 ‖ y2.
    y_ref[...] = jnp.concatenate([y1, y2], axis=-1).astype(y_ref.dtype)


@jax.jit
def reversible_block(x1, x2, ln1_w, ln1_b, w_qkv, b_qkv, w_proj, b_proj,
                     ln2_w, ln2_b, w1, b1, w2, b2):
    # Flatten tokens and present x1‖x2 as a single lane-dense slab (free XLA layout work).
    x_slab = jnp.concatenate([x1.reshape(BN, DIM), x2.reshape(BN, DIM)], axis=-1)

    # Pack every small vector parameter into one (8, 128) f32 slab -> one DMA.
    def row(v):
        v = v.reshape(1, -1).astype(jnp.float32)
        return jnp.pad(v, ((0, 0), (0, LANE - v.shape[1])))

    param_slab = jnp.concatenate(
        [row(ln1_w), row(ln1_b), row(b_qkv), row(b_proj),
         row(ln2_w), row(ln2_b), row(b1), row(b2)], axis=0)        # (8, 128)

    def full(shape):
        return pl.BlockSpec(shape, lambda i, _n=len(shape): (0,) * _n)

    y_slab = pl.pallas_call(
        _reversible_block_kernel,
        out_shape=jax.ShapeDtypeStruct((BN, 2 * DIM), x1.dtype),
        grid_spec=pltpu.PrefetchScalarGridSpec(
            num_scalar_prefetch=0,
            grid=(1,),                                   # single step — no per-step overhead
            in_specs=[
                full((BN, 2 * DIM)),                     # x1 ‖ x2
                full((8, LANE)),                         # packed LN/bias parameter slab
                full((DIM, 3 * DIM_OUT)),                # fused qkv weight (lane-dense)
                full((DIM_OUT, DIM_OUT)),                # output projection weight
                full((DIM, HIDDEN)),                     # MLP fc1 weight
                full((HIDDEN, DIM)),                     # MLP fc2 weight
            ],
            out_specs=full((BN, 2 * DIM)),               # y1 ‖ y2, single lane-dense output
        ),
        input_output_aliases={0: 0},                     # reuse the x-slab HBM buffer for y
        compiler_params=pltpu.CompilerParams(
            dimension_semantics=("arbitrary",)),
    )(x_slab, param_slab, w_qkv, w_proj, w1, w2)

    y1 = y_slab[:, 0:DIM].reshape(B, N, DIM)
    y2 = y_slab[:, DIM:2 * DIM].reshape(B, N, DIM)
    return y1, y2


def _reference(x1, x2, ln1_w, ln1_b, w_qkv, b_qkv, w_proj, b_proj,
               ln2_w, ln2_b, w1, b1, w2, b2):
    """Pure-JAX reference mirroring the PyTorch ReversibleBlock forward."""
    def ln(x, w, b):
        mu = jnp.mean(x, axis=-1, keepdims=True)
        var = jnp.mean((x - mu) ** 2, axis=-1, keepdims=True)
        return (x - mu) / jnp.sqrt(var + EPS) * w + b

    # F = AttentionSubBlock
    xn = ln(x2.astype(jnp.float32), ln1_w[0], ln1_b[0])
    qkv = xn @ w_qkv + b_qkv[0]
    qkv = qkv.reshape(B, N, 3, NUM_HEADS, HEAD_DIM).transpose(2, 0, 3, 1, 4)
    q, k, v = qkv[0], qkv[1], qkv[2]                             # (B, H, N, hd)
    attn = jax.nn.softmax((q * SCALE) @ jnp.swapaxes(k, -2, -1), axis=-1)
    o = attn @ v + q                                             # residual pooling
    o = o.transpose(0, 2, 1, 3).reshape(B, N, DIM_OUT)
    y1 = x1 + (o @ w_proj + b_proj[0])

    # G = MLPSubblock (tanh-GELU to match the kernel; nn.GELU default is exact erf)
    yn = ln(y1, ln2_w[0], ln2_b[0])
    g = jax.nn.gelu(yn @ w1 + b1[0], approximate=True) @ w2 + b2[0]
    y2 = x2 + g
    return y1, y2


if __name__ == "__main__":
    key = jax.random.PRNGKey(0)
    keys = jax.random.split(key, 14)

    x1 = jax.random.normal(keys[0], (B, N, DIM), dtype=jnp.float32)
    x2 = jax.random.normal(keys[1], (B, N, DIM), dtype=jnp.float32)

    # deterministic synthetic parameters (shapes from the module's __init__)
    ln1_w = 1.0 + 0.02 * jax.random.normal(keys[2], (1, DIM), dtype=jnp.float32)
    ln1_b = 0.02 * jax.random.normal(keys[3], (1, DIM), dtype=jnp.float32)
    w_qkv = jax.random.normal(keys[4], (DIM, 3 * DIM_OUT), dtype=jnp.float32) * (DIM ** -0.5)
    b_qkv = 0.02 * jax.random.normal(keys[5], (1, 3 * DIM_OUT), dtype=jnp.float32)
    w_proj = jax.random.normal(keys[6], (DIM_OUT, DIM_OUT), dtype=jnp.float32) * (DIM_OUT ** -0.5)
    b_proj = 0.02 * jax.random.normal(keys[7], (1, DIM_OUT), dtype=jnp.float32)
    ln2_w = 1.0 + 0.02 * jax.random.normal(keys[8], (1, DIM), dtype=jnp.float32)
    ln2_b = 0.02 * jax.random.normal(keys[9], (1, DIM), dtype=jnp.float32)
    w1 = jax.random.normal(keys[10], (DIM, HIDDEN), dtype=jnp.float32) * (DIM ** -0.5)
    b1 = 0.02 * jax.random.normal(keys[11], (1, HIDDEN), dtype=jnp.float32)
    w2 = jax.random.normal(keys[12], (HIDDEN, DIM), dtype=jnp.float32) * (HIDDEN ** -0.5)
    b2 = 0.02 * jax.random.normal(keys[13], (1, DIM), dtype=jnp.float32)

    args = (x1, x2, ln1_w, ln1_b, w_qkv, b_qkv, w_proj, b_proj,
            ln2_w, ln2_b, w1, b1, w2, b2)

    y1, y2 = reversible_block(*args)
    (y1, y2) = jax.block_until_ready((y1, y2))

    r1, r2 = _reference(*args)
    assert y1.shape == (B, N, DIM) and y2.shape == (B, N, DIM)
    assert jnp.allclose(y1, r1, atol=1e-3, rtol=1e-3), "Y_1 mismatch vs reference"
    assert jnp.allclose(y2, r2, atol=1e-3, rtol=1e-3), "Y_2 mismatch vs reference"

    print("KERNEL_OK")
</pallas_src>

<mosaic_0001>
module attributes {stable_mosaic.version = 11 : i64} {
  func.func @_reversible_block_kernel(%arg0: i32, %arg1: memref<16x64xf32, #tpu.memory_space<vmem>>, %arg2: memref<8x128xf32, #tpu.memory_space<vmem>>, %arg3: memref<32x96xf32, #tpu.memory_space<vmem>>, %arg4: memref<32x32xf32, #tpu.memory_space<vmem>>, %arg5: memref<32x128xf32, #tpu.memory_space<vmem>>, %arg6: memref<128x32xf32, #tpu.memory_space<vmem>>, %arg7: memref<16x64xf32, #tpu.memory_space<vmem>>) attributes {dimension_semantics = [#tpu.dimension_semantics<arbitrary>], iteration_bounds = array<i64: 1>, scalar_prefetch = 0 : i64, scratch_operands = 0 : i64, tpu.core_type = #tpu.core_type<tc>, window_params = [{pipeline_mode = #tpu.pipeline_mode<synchronous>, transform_indices = @transform_0, window_bounds = array<i64: 16, 64>}, {pipeline_mode = #tpu.pipeline_mode<synchronous>, transform_indices = @transform_1, window_bounds = array<i64: 8, 128>}, {pipeline_mode = #tpu.pipeline_mode<synchronous>, transform_indices = @transform_2, window_bounds = array<i64: 32, 96>}, {pipeline_mode = #tpu.pipeline_mode<synchronous>, transform_indices = @transform_3, window_bounds = array<i64: 32, 32>}, {pipeline_mode = #tpu.pipeline_mode<synchronous>, transform_indices = @transform_4, window_bounds = array<i64: 32, 128>}, {pipeline_mode = #tpu.pipeline_mode<synchronous>, transform_indices = @transform_5, window_bounds = array<i64: 128, 32>}, {pipeline_mode = #tpu.pipeline_mode<synchronous>, transform_indices = @transform_6, window_bounds = array<i64: 16, 64>}]} {
    %c0 = arith.constant 0 : index
    %c0_0 = arith.constant 0 : index
    %0 = vector.load %arg1[%c0, %c0_0] : memref<16x64xf32, #tpu.memory_space<vmem>>, vector<16x64xf32>
    %1 = vector.extract_strided_slice %0 {offsets = [0, 0], sizes = [16, 32], strides = [1, 1]} : vector<16x64xf32> to vector<16x32xf32>
    %2 = vector.extract_strided_slice %0 {offsets = [0, 32], sizes = [16, 32], strides = [1, 1]} : vector<16x64xf32> to vector<16x32xf32>
    %c0_1 = arith.constant 0 : index
    %c0_2 = arith.constant 0 : index
    %3 = vector.load %arg2[%c0_1, %c0_2] : memref<8x128xf32, #tpu.memory_space<vmem>>, vector<1x32xf32>
    %c1 = arith.constant 1 : index
    %c0_3 = arith.constant 0 : index
    %4 = vector.load %arg2[%c1, %c0_3] : memref<8x128xf32, #tpu.memory_space<vmem>>, vector<1x32xf32>
    %c2 = arith.constant 2 : index
    %c0_4 = arith.constant 0 : index
    %5 = vector.load %arg2[%c2, %c0_4] : memref<8x128xf32, #tpu.memory_space<vmem>>, vector<1x96xf32>
    %c3 = arith.constant 3 : index
    %c0_5 = arith.constant 0 : index
    %6 = vector.load %arg2[%c3, %c0_5] : memref<8x128xf32, #tpu.memory_space<vmem>>, vector<1x32xf32>
    %c4 = arith.constant 4 : index
    %c0_6 = arith.constant 0 : index
    %7 = vector.load %arg2[%c4, %c0_6] : memref<8x128xf32, #tpu.memory_space<vmem>>, vector<1x32xf32>
    %c5 = arith.constant 5 : index
    %c0_7 = arith.constant 0 : index
    %8 = vector.load %arg2[%c5, %c0_7] : memref<8x128xf32, #tpu.memory_space<vmem>>, vector<1x32xf32>
    %c6 = arith.constant 6 : index
    %c0_8 = arith.constant 0 : index
    %9 = vector.load %arg2[%c6, %c0_8] : memref<8x128xf32, #tpu.memory_space<vmem>>, vector<1x128xf32>
    %c7 = arith.constant 7 : index
    %c0_9 = arith.constant 0 : index
    %10 = vector.load %arg2[%c7, %c0_9] : memref<8x128xf32, #tpu.memory_space<vmem>>, vector<1x32xf32>
    %cst = arith.constant dense<0.000000e+00> : vector<16xf32>
    %11 = vector.multi_reduction <add>, %2, %cst [1] : vector<16x32xf32> to vector<16xf32>
    %12 = vector.shape_cast %11 : vector<16xf32> to vector<16x1xf32>
    %cst_10 = arith.constant 3.200000e+01 : f32
    %13 = vector.broadcast %cst_10 : f32 to vector<16x1xf32>
    %14 = arith.divf %12, %13 : vector<16x1xf32>
    %15 = vector.broadcast %14 : vector<16x1xf32> to vector<16x32xf32>
    %16 = arith.subf %2, %15 : vector<16x32xf32>
    %17 = vector.broadcast %14 : vector<16x1xf32> to vector<16x32xf32>
    %18 = arith.subf %2, %17 : vector<16x32xf32>
    %19 = arith.mulf %16, %18 : vector<16x32xf32>
    %cst_11 = arith.constant dense<0.000000e+00> : vector<16xf32>
    %20 = vector.multi_reduction <add>, %19, %cst_11 [1] : vector<16x32xf32> to vector<16xf32>
    %21 = vector.shape_cast %20 : vector<16xf32> to vector<16x1xf32>
    %cst_12 = arith.constant 3.200000e+01 : f32
    %22 = vector.broadcast %cst_12 : f32 to vector<16x1xf32>
    %23 = arith.divf %21, %22 : vector<16x1xf32>
    %24 = vector.broadcast %14 : vector<16x1xf32> to vector<16x32xf32>
    %25 = arith.subf %2, %24 : vector<16x32xf32>
    %cst_13 = arith.constant 9.99999997E-7 : f32
    %26 = vector.broadcast %cst_13 : f32 to vector<16x1xf32>
    %27 = arith.addf %23, %26 : vector<16x1xf32>
    %28 = math.rsqrt %27 : vector<16x1xf32>
    %29 = vector.broadcast %28 : vector<16x1xf32> to vector<16x32xf32>
    %30 = arith.mulf %25, %29 : vector<16x32xf32>
    %31 = vector.broadcast %3 : vector<1x32xf32> to vector<16x32xf32>
    %32 = arith.mulf %30, %31 : vector<16x32xf32>
    %33 = vector.broadcast %4 : vector<1x32xf32> to vector<16x32xf32>
    %34 = arith.addf %32, %33 : vector<16x32xf32>
    %c0_14 = arith.constant 0 : index
    %c0_15 = arith.constant 0 : index
    %35 = vector.load %arg3[%c0_14, %c0_15] : memref<32x96xf32, #tpu.memory_space<vmem>>, vector<32x96xf32>
    %cst_16 = arith.constant dense<0.000000e+00> : vector<16x96xf32>
    %36 = tpu.matmul %34, %35, %cst_16 {dimension_numbers = #tpu.dot_dimension_numbers<[1], [0], [0], [1], [0, 0, 1, 1], [], []>} : vector<16x32xf32>, vector<32x96xf32>, vector<16x96xf32> -> vector<16x96xf32>
    %37 = vector.broadcast %5 : vector<1x96xf32> to vector<16x96xf32>
    %38 = arith.addf %36, %37 : vector<16x96xf32>
    %39 = vector.extract_strided_slice %38 {offsets = [0, 0], sizes = [16, 32], strides = [1, 1]} : vector<16x96xf32> to vector<16x32xf32>
    %40 = vector.extract_strided_slice %38 {offsets = [0, 32], sizes = [16, 32], strides = [1, 1]} : vector<16x96xf32> to vector<16x32xf32>
    %41 = vector.extract_strided_slice %38 {offsets = [0, 64], sizes = [16, 32], strides = [1, 1]} : vector<16x96xf32> to vector<16x32xf32>
    %42 = vector.extract_strided_slice %39 {offsets = [0, 0], sizes = [16, 16], strides = [1, 1]} : vector<16x32xf32> to vector<16x16xf32>
    %43 = vector.shape_cast %42 : vector<16x16xf32> to vector<2x8x16xf32>
    %44 = vector.extract_strided_slice %40 {offsets = [0, 0], sizes = [16, 16], strides = [1, 1]} : vector<16x32xf32> to vector<16x16xf32>
    %45 = vector.shape_cast %44 : vector<16x16xf32> to vector<2x8x16xf32>
    %46 = vector.extract_strided_slice %41 {offsets = [0, 0], sizes = [16, 16], strides = [1, 1]} : vector<16x32xf32> to vector<16x16xf32>
    %47 = vector.shape_cast %46 : vector<16x16xf32> to vector<2x8x16xf32>
    %cst_17 = arith.constant 2.500000e-01 : f32
    %48 = vector.broadcast %cst_17 : f32 to vector<2x8x16xf32>
    %49 = arith.mulf %43, %48 : vector<2x8x16xf32>
    "tpu.trace_start"() <{level = 10 : i32, message = "bnd,bmd->bnm"}> : () -> ()
    %cst_18 = arith.constant dense<0.000000e+00> : vector<2x8x8xf32>
    %50 = tpu.matmul %49, %45, %cst_18 {dimension_numbers = #tpu.dot_dimension_numbers<[2], [2], [1], [1], [0, 0, 0, 1, 1, 1], [0], [0]>} : vector<2x8x16xf32>, vector<2x8x16xf32>, vector<2x8x8xf32> -> vector<2x8x8xf32>
    "tpu.trace_stop"() : () -> ()
    %cst_19 = arith.constant dense<0xFF800000> : vector<2x8xf32>
    %51 = vector.multi_reduction <maximumf>, %50, %cst_19 [2] : vector<2x8x8xf32> to vector<2x8xf32>
    %52 = vector.shape_cast %51 : vector<2x8xf32> to vector<2x8x1xf32>
    %53 = vector.broadcast %52 : vector<2x8x1xf32> to vector<2x8x8xf32>
    %54 = arith.subf %50, %53 : vector<2x8x8xf32>
    %55 = math.exp %54 : vector<2x8x8xf32>
    %cst_20 = arith.constant dense<0.000000e+00> : vector<2x8xf32>
    %56 = vector.multi_reduction <add>, %55, %cst_20 [2] : vector<2x8x8xf32> to vector<2x8xf32>
    %57 = vector.shape_cast %56 : vector<2x8xf32> to vector<2x8x1xf32>
    %58 = vector.broadcast %57 : vector<2x8x1xf32> to vector<2x8x8xf32>
    %59 = arith.divf %55, %58 : vector<2x8x8xf32>
    "tpu.trace_start"() <{level = 10 : i32, message = "bnm,bmd->bnd"}> : () -> ()
    %cst_21 = arith.constant dense<0.000000e+00> : vector<2x8x16xf32>
    %60 = tpu.matmul %59, %47, %cst_21 {dimension_numbers = #tpu.dot_dimension_numbers<[2], [1], [1], [2], [0, 0, 0, 1, 1, 2], [0], [0]>} : vector<2x8x8xf32>, vector<2x8x16xf32>, vector<2x8x16xf32> -> vector<2x8x16xf32>
    "tpu.trace_stop"() : () -> ()
    %61 = arith.addf %60, %43 : vector<2x8x16xf32>
    %62 = vector.extract_strided_slice %39 {offsets = [0, 16], sizes = [16, 16], strides = [1, 1]} : vector<16x32xf32> to vector<16x16xf32>
    %63 = vector.shape_cast %62 : vector<16x16xf32> to vector<2x8x16xf32>
    %64 = vector.extract_strided_slice %40 {offsets = [0, 16], sizes = [16, 16], strides = [1, 1]} : vector<16x32xf32> to vector<16x16xf32>
    %65 = vector.shape_cast %64 : vector<16x16xf32> to vector<2x8x16xf32>
    %66 = vector.extract_strided_slice %41 {offsets = [0, 16], sizes = [16, 16], strides = [1, 1]} : vector<16x32xf32> to vector<16x16xf32>
    %67 = vector.shape_cast %66 : vector<16x16xf32> to vector<2x8x16xf32>
    %cst_22 = arith.constant 2.500000e-01 : f32
    %68 = vector.broadcast %cst_22 : f32 to vector<2x8x16xf32>
    %69 = arith.mulf %63, %68 : vector<2x8x16xf32>
    "tpu.trace_start"() <{level = 10 : i32, message = "bnd,bmd->bnm"}> : () -> ()
    %cst_23 = arith.constant dense<0.000000e+00> : vector<2x8x8xf32>
    %70 = tpu.matmul %69, %65, %cst_23 {dimension_numbers = #tpu.dot_dimension_numbers<[2], [2], [1], [1], [0, 0, 0, 1, 1, 1], [0], [0]>} : vector<2x8x16xf32>, vector<2x8x16xf32>, vector<2x8x8xf32> -> vector<2x8x8xf32>
    "tpu.trace_stop"() : () -> ()
    %cst_24 = arith.constant dense<0xFF800000> : vector<2x8xf32>
    %71 = vector.multi_reduction <maximumf>, %70, %cst_24 [2] : vector<2x8x8xf32> to vector<2x8xf32>
    %72 = vector.shape_cast %71 : vector<2x8xf32> to vector<2x8x1xf32>
    %73 = vector.broadcast %72 : vector<2x8x1xf32> to vector<2x8x8xf32>
    %74 = arith.subf %70, %73 : vector<2x8x8xf32>
    %75 = math.exp %74 : vector<2x8x8xf32>
    %cst_25 = arith.constant dense<0.000000e+00> : vector<2x8xf32>
    %76 = vector.multi_reduction <add>, %75, %cst_25 [2] : vector<2x8x8xf32> to vector<2x8xf32>
    %77 = vector.shape_cast %76 : vector<2x8xf32> to vector<2x8x1xf32>
    %78 = vector.broadcast %77 : vector<2x8x1xf32> to vector<2x8x8xf32>
    %79 = arith.divf %75, %78 : vector<2x8x8xf32>
    "tpu.trace_start"() <{level = 10 : i32, message = "bnm,bmd->bnd"}> : () -> ()
    %cst_26 = arith.constant dense<0.000000e+00> : vector<2x8x16xf32>
    %80 = tpu.matmul %79, %67, %cst_26 {dimension_numbers = #tpu.dot_dimension_numbers<[2], [1], [1], [2], [0, 0, 0, 1, 1, 2], [0], [0]>} : vector<2x8x8xf32>, vector<2x8x16xf32>, vector<2x8x16xf32> -> vector<2x8x16xf32>
    "tpu.trace_stop"() : () -> ()
    %81 = arith.addf %80, %63 : vector<2x8x16xf32>
    %82 = tpu.concatenate %61, %81 in 2 : vector<2x8x16xf32>, vector<2x8x16xf32> -> vector<2x8x32xf32>
    %83 = vector.shape_cast %82 : vector<2x8x32xf32> to vector<16x32xf32>
    %c0_27 = arith.constant 0 : index
    %c0_28 = arith.constant 0 : index
    %84 = vector.load %arg4[%c0_27, %c0_28] : memref<32x32xf32, #tpu.memory_space<vmem>>, vector<32x32xf32>
    %cst_29 = arith.constant dense<0.000000e+00> : vector<16x32xf32>
    %85 = tpu.matmul %83, %84, %cst_29 {dimension_numbers = #tpu.dot_dimension_numbers<[1], [0], [0], [1], [0, 0, 1, 1], [], []>} : vector<16x32xf32>, vector<32x32xf32>, vector<16x32xf32> -> vector<16x32xf32>
    %86 = vector.broadcast %6 : vector<1x32xf32> to vector<16x32xf32>
    %87 = arith.addf %85, %86 : vector<16x32xf32>
    %88 = arith.addf %1, %87 : vector<16x32xf32>
    %cst_30 = arith.constant dense<0.000000e+00> : vector<16xf32>
    %89 = vector.multi_reduction <add>, %88, %cst_30 [1] : vector<16x32xf32> to vector<16xf32>
    %90 = vector.shape_cast %89 : vector<16xf32> to vector<16x1xf32>
    %cst_31 = arith.constant 3.200000e+01 : f32
    %91 = vector.broadcast %cst_31 : f32 to vector<16x1xf32>
    %92 = arith.divf %90, %91 : vector<16x1xf32>
    %93 = vector.broadcast %92 : vector<16x1xf32> to vector<16x32xf32>
    %94 = arith.subf %88, %93 : vector<16x32xf32>
    %95 = vector.broadcast %92 : vector<16x1xf32> to vector<16x32xf32>
    %96 = arith.subf %88, %95 : vector<16x32xf32>
    %97 = arith.mulf %94, %96 : vector<16x32xf32>
    %cst_32 = arith.constant dense<0.000000e+00> : vector<16xf32>
    %98 = vector.multi_reduction <add>, %97, %cst_32 [1] : vector<16x32xf32> to vector<16xf32>
    %99 = vector.shape_cast %98 : vector<16xf32> to vector<16x1xf32>
    %cst_33 = arith.constant 3.200000e+01 : f32
    %100 = vector.broadcast %cst_33 : f32 to vector<16x1xf32>
    %101 = arith.divf %99, %100 : vector<16x1xf32>
    %102 = vector.broadcast %92 : vector<16x1xf32> to vector<16x32xf32>
    %103 = arith.subf %88, %102 : vector<16x32xf32>
    %cst_34 = arith.constant 9.99999997E-7 : f32
    %104 = vector.broadcast %cst_34 : f32 to vector<16x1xf32>
    %105 = arith.addf %101, %104 : vector<16x1xf32>
    %106 = math.rsqrt %105 : vector<16x1xf32>
    %107 = vector.broadcast %106 : vector<16x1xf32> to vector<16x32xf32>
    %108 = arith.mulf %103, %107 : vector<16x32xf32>
    %109 = vector.broadcast %7 : vector<1x32xf32> to vector<16x32xf32>
    %110 = arith.mulf %108, %109 : vector<16x32xf32>
    %111 = vector.broadcast %8 : vector<1x32xf32> to vector<16x32xf32>
    %112 = arith.addf %110, %111 : vector<16x32xf32>
    %c0_35 = arith.constant 0 : index
    %c0_36 = arith.constant 0 : index
    %113 = vector.load %arg5[%c0_35, %c0_36] : memref<32x128xf32, #tpu.memory_space<vmem>>, vector<32x128xf32>
    %cst_37 = arith.constant dense<0.000000e+00> : vector<16x128xf32>
    %114 = tpu.matmul %112, %113, %cst_37 {dimension_numbers = #tpu.dot_dimension_numbers<[1], [0], [0], [1], [0, 0, 1, 1], [], []>} : vector<16x32xf32>, vector<32x128xf32>, vector<16x128xf32> -> vector<16x128xf32>
    %115 = vector.broadcast %9 : vector<1x128xf32> to vector<16x128xf32>
    %116 = arith.addf %114, %115 : vector<16x128xf32>
    %117 = arith.mulf %116, %116 : vector<16x128xf32>
    %118 = arith.mulf %116, %117 : vector<16x128xf32>
    %cst_38 = arith.constant 4.471500e-02 : f32
    %119 = vector.broadcast %cst_38 : f32 to vector<16x128xf32>
    %120 = arith.mulf %119, %118 : vector<16x128xf32>
    %121 = arith.addf %116, %120 : vector<16x128xf32>
    %cst_39 = arith.constant 0.797884583 : f32
    %122 = vector.broadcast %cst_39 : f32 to vector<16x128xf32>
    %123 = arith.mulf %122, %121 : vector<16x128xf32>
    %124 = math.tanh %123 : vector<16x128xf32>
    %cst_40 = arith.constant 1.000000e+00 : f32
    %125 = vector.broadcast %cst_40 : f32 to vector<16x128xf32>
    %126 = arith.addf %125, %124 : vector<16x128xf32>
    %cst_41 = arith.constant 5.000000e-01 : f32
    %127 = vector.broadcast %cst_41 : f32 to vector<16x128xf32>
    %128 = arith.mulf %127, %126 : vector<16x128xf32>
    %129 = arith.mulf %116, %128 : vector<16x128xf32>
    %c0_42 = arith.constant 0 : index
    %c0_43 = arith.constant 0 : index
    %130 = vector.load %arg6[%c0_42, %c0_43] : memref<128x32xf32, #tpu.memory_space<vmem>>, vector<128x32xf32>
    %cst_44 = arith.constant dense<0.000000e+00> : vector<16x32xf32>
    %131 = tpu.matmul %129, %130, %cst_44 {dimension_numbers = #tpu.dot_dimension_numbers<[1], [0], [0], [1], [0, 0, 1, 1], [], []>} : vector<16x128xf32>, vector<128x32xf32>, vector<16x32xf32> -> vector<16x32xf32>
    %132 = vector.broadcast %10 : vector<1x32xf32> to vector<16x32xf32>
    %133 = arith.addf %131, %132 : vector<16x32xf32>
    %134 = arith.addf %2, %133 : vector<16x32xf32>
    %135 = tpu.concatenate %88, %134 in 1 : vector<16x32xf32>, vector<16x32xf32> -> vector<16x64xf32>
    %c0_45 = arith.constant 0 : index
    %c0_46 = arith.constant 0 : index
    %136 = vector.load %arg7[%c0_45, %c0_46] : memref<16x64xf32, #tpu.memory_space<vmem>>, vector<16x64xf32>
    tpu.vector_store %arg7[%c0_45, %c0_46], %135 {strides = array<i32>} : memref<16x64xf32, #tpu.memory_space<vmem>>, vector<16x64xf32>,
    return
  }
  func.func @transform_0(%arg0: i32) -> (i32, i32) {
    %c0_i32 = arith.constant 0 : i32
    %c0_i32_0 = arith.constant 0 : i32
    %c0_i32_1 = arith.constant 0 : i32
    return %c0_i32, %c0_i32_0 : i32, i32
  }
  func.func @transform_1(%arg0: i32) -> (i32, i32) {
    %c0_i32 = arith.constant 0 : i32
    %c0_i32_0 = arith.constant 0 : i32
    %c0_i32_1 = arith.constant 0 : i32
    return %c0_i32, %c0_i32_0 : i32, i32
  }
  func.func @transform_2(%arg0: i32) -> (i32, i32) {
    %c0_i32 = arith.constant 0 : i32
    %c0_i32_0 = arith.constant 0 : i32
    %c0_i32_1 = arith.constant 0 : i32
    return %c0_i32, %c0_i32_0 : i32, i32
  }
  func.func @transform_3(%arg0: i32) -> (i32, i32) {
    %c0_i32 = arith.constant 0 : i32
    %c0_i32_0 = arith.constant 0 : i32
    %c0_i32_1 = arith.constant 0 : i32
    return %c0_i32, %c0_i32_0 : i32, i32
  }
  func.func @transform_4(%arg0: i32) -> (i32, i32) {
    %c0_i32 = arith.constant 0 : i32
    %c0_i32_0 = arith.constant 0 : i32
    %c0_i32_1 = arith.constant 0 : i32
    return %c0_i32, %c0_i32_0 : i32, i32
  }
  func.func @transform_5(%arg0: i32) -> (i32, i32) {
    %c0_i32 = arith.constant 0 : i32
    %c0_i32_0 = arith.constant 0 : i32
    %c0_i32_1 = arith.constant 0 : i32
    return %c0_i32, %c0_i32_0 : i32, i32
  }
  func.func @transform_6(%arg0: i32) -> (i32, i32) {
    %c0_i32 = arith.constant 0 : i32
    %c0_i32_0 = arith.constant 0 : i32
    %c0_i32_1 = arith.constant 0 : i32
    return %c0_i32, %c0_i32_0 : i32, i32
  }
}

</mosaic_0001>

<bundles_post_ra>
// kernel: reversible_block.1
= control target key start
LH: loop header
LB: loop body
LE: loop exit
PB: predicated region body
PF: predicated region fallthrough
CT: control target
= control target key end

     0   :  { %s1499_s23 = smov 96   ;;  %vm41_vm0 = vcmask 261120   ;;  %s1500_s29 = smov 32   ;;  %v1501_v44 = vmov 0.0   ;;  %vm1502_vm1 = vmmov 0   ;;  %vm195_vm2 = vcmask 130048   ;;  %s1787_s0 = inlined_call_operand.vmem [shape: f32[16,64], index: 0, kind: input, shape index: {}, may-alias: {0,6}]   ;;  %s1788_s1 = inlined_call_operand.vmem [shape: f32[8,128], index: 1, kind: input, shape index: {}]   ;;  %s1789_s2 = inlined_call_operand.vmem [shape: f32[32,96], index: 2, kind: input, shape index: {}]   ;;  %s1790_s3 = inlined_call_operand.vmem [shape: f32[32,32], index: 3, kind: input, shape index: {}]   ;;  %s1791_s4 = inlined_call_operand.vmem [shape: f32[32,128], index: 4, kind: input, shape index: {}]   ;;  %s1792_s5 = inlined_call_operand.vmem [shape: f32[128,32], index: 5, kind: input, shape index: {}]   ;;  %s1793_s6 = inlined_call_operand.vmem [shape: f32[16,64], index: 6, kind: output, shape index: {}, may-alias: {0,6}]  }
   0x1   :  { %v1546_v0 = vld [vmem:[%s1787_s0] sm:$0xff]  ;;  %v1553_v1 = vld [vmem:[%s1787_s0 + $0x8] sm:$0xff]  ;;  %v99_v28 = vld [vmem:[%s1789_s2 + $0x10] sm:$0xff]  ;;  %1319 = vmatprep.subr.mxu0 %v1501_v44  ;;  %1321 = vmatprep.mubr.msk.f32.mxu0 %vm1502_vm1, %v1501_v44  ;;  %vm349_vm3 = vcmask 64512   ;;  %s1503_s15 = smov 64   ;;  %s1504_s16 = smov 80  }
   0x2   :  { %35 = vrot.lane.b32.xlu0 %v1546_v0, %s1499_s23  ;;  %v1221_v18 = vld [vmem:[%s1788_s1 + $0x1] ss:$0 sm:$0xff]  ;;  %v1220_v19 = vld [vmem:[%s1788_s1] ss:$0 sm:$0xff]  ;;  %v98_v21 = vld [vmem:[%s1789_s2 + $0x8] sm:$0xff]  ;;  %s1505_s17 = smov 112  }
   0x3   :  { %v97_v20 = vld [vmem:[%s1789_s2] sm:$0xff]  ;;  %v100_v29 = vld [vmem:[%s1789_s2 + $0x18] sm:$0xff]  ;;  %s1506_s18 = smov 48   ;;  %s1507_s26 = smov 16   ;;  %vm1213_vm4 = vcmask 523264  }
   0x4   :  { %v1406_v22 = vpack.c.bf16 %v98_v21, %v97_v20  ;;  %v1410_v31 = vpack.c.bf16 %v100_v29, %v99_v28  ;;  %v1222_v45 = vld [vmem:[%s1788_s1 + $0x2] ss:$0 sm:$0xff] }
   0x6   :  { %37 = vrot.lane.b32.xlu0 %v1553_v1, %s1499_s23  ;;  %1407 = vmatprep.subr.bf16.mxu1 %v1406_v22 }
   0x7   :  { %1409 = vmatpush3.bf16.msra.mxu1 %v1406_v22 }
   0x8   :  { %1411 = vmatprep.subr.bf16.mxu1 %v1410_v31 }
   0xb   :  { %1413 = vmatpush3.bf16.msra.mxu1 %v1410_v31 }
   0xc   :  { %1309 = vmatprep.subr.mxu1 %v1501_v44 }
  0x74   :  { %v36_v2 = vpop.permute.xlu0 %35 }
  0x75   :  { %v42_v3 = vsel %vm41_vm0, %v36_v2, 0.0 }
  0x76   :  { %43 = vadd.xlane.f32.xlu1 %v42_v3 }
  0x78   :  { %v38_v4 = vpop.permute.xlu0 %37 }
  0x79   :  { %v45_v5 = vsel %vm41_vm0, %v38_v4, 0.0 }
  0x7a   :  { %46 = vadd.xlane.f32.xlu1 %v45_v5 }
 0x103   :  { %v44_v6 = vpop.xlane.xlu1 %43 }
 0x104   :  { %v49_v7 = vmul.f32 0.03125, %v44_v6 }
 0x106   :  { %v51_v8 = vsub.f32 %v1546_v0, %v49_v7 }
 0x107   :  { %v47_v9 = vpop.xlane.xlu1 %46 }
 0x108   :  { %v50_v10 = vmul.f32 0.03125, %v47_v9  ;;  %v53_v11 = vmul.f32 %v51_v8, %v51_v8 }
 0x10a   :  { %v52_v12 = vsub.f32 %v1553_v1, %v50_v10  ;;  %57 = vrot.lane.b32.xlu0 %v53_v11, %s1499_s23 }
 0x10c   :  { %v54_v13 = vmul.f32 %v52_v12, %v52_v12 }
 0x10e   :  { %59 = vrot.lane.b32.xlu1 %v54_v13, %s1499_s23 }
 0x17c   :  { %v58_v14 = vpop.permute.xlu0 %57 }
 0x17d   :  { %v63_v15 = vsel %vm41_vm0, %v58_v14, 0.0 }
 0x17e   :  { %64 = vadd.xlane.f32.xlu0 %v63_v15 }
 0x180   :  { %v60_v16 = vpop.permute.xlu1 %59 }
 0x181   :  { %v66_v17 = vsel %vm41_vm0, %v60_v16, 0.0 }
 0x182   :  { %67 = vadd.xlane.f32.xlu1 %v66_v17 }
 0x193   :  { %92 = vrot.lane.b32.xlu1 %v1221_v18, %s1500_s29 }
 0x194   :  { %82 = vrot.lane.b32.xlu0 %v1220_v19, %s1500_s29 }
 0x20b   :  { %v65_v23 = vpop.xlane.xlu0 %64 }
 0x20c   :  { %v69_v24 = vmul.f32 0.03125, %v65_v23 }
 0x20e   :  { %v71_v25 = vadd.f32 1e-06, %v69_v24 }
 0x20f   :  { %v68_v26 = vpop.xlane.xlu1 %67  ;;  %v83_v33 = vpop.permute.xlu0 %82 }
 0x210   :  { %1471 = vrsqrt.f32 %v71_v25  ;;  %v70_v27 = vmul.f32 0.03125, %v68_v26 }
 0x212   :  { %v72_v30 = vadd.f32 1e-06, %v70_v27 }
 0x213   :  { %v93_v35 = vpop.permute.xlu1 %92 }
 0x214   :  { %1473 = vrsqrt.f32 %v72_v30 }
 0x21a   :  { %v1472_v32 = vpop.eup %1471 }
 0x21b   :  { %v75_v34 = vmul.f32 %v1472_v32, %v51_v8 }
 0x21d   :  { %v85_v36 = vmul.f32 %v83_v33, %v75_v34 }
 0x21e   :  { %v1474_v37 = vpop.eup %1473 }
 0x21f   :  { %v76_v38 = vmul.f32 %v1474_v37, %v52_v12  ;;  %v95_v39 = vadd.f32 %v93_v35, %v85_v36 }
 0x221   :  { %v86_v40 = vmul.f32 %v83_v33, %v76_v38  ;;  %107 = vrot.lane.b32.xlu0 %v95_v39, %s1499_s23 }
 0x223   :  { %v96_v41 = vadd.f32 %v93_v35, %v86_v40 }
 0x225   :  { %109 = vrot.lane.b32.xlu0 %v96_v41, %s1499_s23 }
 0x293   :  { %v108_v42 = vpop.permute.xlu0 %107 }
 0x294   :  { %1306 = vmatprep.mubr.msk.f32.mxu1 %vm41_vm0, %v108_v42 }
 0x297   :  { %v110_v43 = vpop.permute.xlu0 %109 }
 0x298   :  { %1307 = vmatmul.mubr.msk.f32.vlgmr.msra.gmra.mrb[0].mxu1 %vm41_vm0, %v110_v43 }
 0x299   :  { %1311 = vmatprep.mubr.msk.f32.mxu1 %vm1502_vm1, %v1501_v44 }
 0x36b   :  { %v1308_v46 = vpop.f32.mrb[0].mxu1 }
 0x36c   :  { %v181_v47 = vpop.f32.mrb[1].mxu1  ;;  %v1602_v49 = vadd.f32 %v1308_v46, %v1222_v45 }
 0x36d   :  { %v1598_v48 = vadd.f32 %v1222_v45, %v181_v47 }
 0x36e   :  { %v191_v53 = vmul.f32 0.25, %v1602_v49 }
 0x36f   :  { %193 = vrot.lane.b32.xlu0 %v1598_v48, %s1499_s23  ;;  %v190_v51 = vmul.f32 0.25, %v1598_v48 }
 0x373   :  { %272 = vrot.lane.b32.xlu0 %v1602_v49, %s1499_s23 }
 0x3e1   :  { %v194_v50 = vpop.permute.xlu0 %193 }
 0x3e2   :  { %1310 = vmatpush3.xpose.msk.msra.mxu1 %vm195_vm2, %v194_v50  ;;  %v870_v50 = vld [vmem:[%s1790_s3] sm:$0xff] }
 0x3e3   :  { %1314 = vmatprep.subr.mxu1 %v1501_v44 }
 0x3e5   :  { %v273_v52 = vpop.permute.xlu0 %272  ;;  %1312 = vmatmul.mubr.msk.f32.vlgmr.msra.gmra.mrb[2].mxu1 %vm195_vm2, %v190_v51 }
 0x3e6   :  { %1315 = vmatpush3.xpose.msk.msra.mxu1 %vm195_vm2, %v273_v52  ;;  %1316 = vmatprep.mubr.msk.f32.mxu1 %vm1502_vm1, %v1501_v44 }
 0x3e7   :  { %1324 = vmatprep.subr.mxu1 %v1501_v44 }
 0x3e9   :  { %1317 = vmatmul.mubr.msk.f32.vlgmr.msra.gmra.mrb[4].mxu1 %vm195_vm2, %v191_v53 }
 0x3ea   :  { %1326 = vmatprep.mubr.msk.f32.mxu1 %vm1502_vm1, %v1501_v44 }
 0x4b8   :  { %v267_v54 = vpop.f32.mrb[2].mxu1 }
 0x4b9   :  { %v1313_v55 = vpop.f32.mrb[3].mxu1  ;;  %v350_v56 = vsel %vm349_vm3, %v267_v54, -inf }
 0x4ba   :  { %351 = vmax.xlane.f32.xlu1 %v350_v56 }
 0x4bc   :  { %v345_v57 = vpop.f32.mrb[4].mxu1 }
 0x4bd   :  { %v1318_v58 = vpop.f32.mrb[5].mxu1  ;;  %v353_v59 = vsel %vm349_vm3, %v345_v57, -inf }
 0x4be   :  { %354 = vmax.xlane.f32.xlu0 %v353_v59 }
 0x4cb   :  { %448 = vrot.lane.b32.xlu1 %v1602_v49, %s1503_s15 }
 0x4cf   :  { %526 = vrot.lane.b32.xlu1 %v1598_v48, %s1504_s16 }
 0x4d4   :  { %372 = vrot.lane.b32.xlu0 %v1598_v48, %s1503_s15 }
 0x547   :  { %v352_v60 = vpop.xlane.xlu1 %351 }
 0x548   :  { %v356_v61 = vsub.f32 %v267_v54, %v352_v60  ;;  %v873_v54 = vld [vmem:[%s1790_s3 + $0x18] sm:$0xff] }
 0x54a   :  { %v358_v62 = vmul.f32 1.442695, %v356_v61 }
 0x54b   :  { %v449_v63 = vpop.permute.xlu1 %448  ;;  %v355_v2 = vpop.xlane.xlu0 %354 }
 0x54c   :  { %1475 = vpow2.f32 %v358_v62  ;;  %v357_v3 = vsub.f32 %v345_v57, %v355_v2  ;;  %1325 = vmatpush3.msra.mxu1 %v449_v63 }
 0x54d   :  { %1334 = vmatprep.subr.mxu1 %v1501_v44 }
 0x54e   :  { %v360_v4 = vmul.f32 1.442695, %v357_v3 }
 0x54f   :  { %v373_v5 = vpop.permute.xlu0 %372  ;;  %v527_v10 = vpop.permute.xlu1 %526 }
 0x550   :  { %1477 = vpow2.f32 %v360_v4  ;;  %1320 = vmatpush3.msra.mxu0 %v373_v5 }
 0x551   :  { %1329 = vmatprep.subr.mxu0 %v1501_v44 }
 0x556   :  { %v1476_v6 = vpop.eup %1475 }
 0x557   :  { %v362_v7 = vsel %vm349_vm3, %v1476_v6, 0.0 }
 0x558   :  { %363 = vadd.xlane.f32.xlu0 %v362_v7 }
 0x55a   :  { %v1478_v8 = vpop.eup %1477 }
 0x55b   :  { %v365_v9 = vsel %vm349_vm3, %v1478_v8, 0.0 }
 0x55c   :  { %366 = vadd.xlane.f32.xlu1 %v365_v9 }
 0x56d   :  { %524 = vrot.lane.b32.xlu1 %v190_v51, %s1505_s17  ;;  %v871_v51 = vld [vmem:[%s1790_s3 + $0x8] sm:$0xff] }
 0x56e   :  { %604 = vrot.lane.b32.xlu0 %v1602_v49, %s1504_s16  ;;  %v1414_v52 = vpack.c.bf16 %v871_v51, %v870_v50  ;;  %v1107_v50 = vld [vmem:[%s1792_s5 + $0x8] sm:$0xff] }
 0x572   :  { %602 = vrot.lane.b32.xlu0 %v191_v53, %s1505_s17  ;;  %v872_v53 = vld [vmem:[%s1790_s3 + $0x10] sm:$0xff] }
 0x573   :  { %v1418_v55 = vpack.c.bf16 %v873_v54, %v872_v53  ;;  %v1109_v53 = vld [vmem:[%s1792_s5 + $0x18] sm:$0xff] }
 0x5e5   :  { %v364_v11 = vpop.xlane.xlu0 %363 }
 0x5e6   :  { %1479 = vrcp.f32 %v364_v11 }
 0x5e9   :  { %v367_v12 = vpop.xlane.xlu1 %366  ;;  %v605_v16 = vpop.permute.xlu0 %604 }
 0x5ea   :  { %1481 = vrcp.f32 %v367_v12 }
 0x5ed   :  { %v525_v18 = vpop.permute.xlu1 %524  ;;  %v603_v19 = vpop.permute.xlu0 %602 }
 0x5f0   :  { %v1480_v13 = vpop.eup %1479 }
 0x5f1   :  { %v369_v14 = vmul.f32 %v1480_v13, %v1476_v6 }
 0x5f3   :  { %1322 = vmatmul.mubr.msk.f32.vlgmr.msra.gmra.mrb[0].mxu0 %vm349_vm3, %v369_v14 }
 0x5f4   :  { %v1482_v15 = vpop.eup %1481  ;;  %1330 = vmatpush3.xpose.msk.msra.mxu0 %vm195_vm2, %v527_v10  ;;  %1331 = vmatprep.mubr.msk.f32.mxu0 %vm1502_vm1, %v1501_v44 }
 0x5f5   :  { %v371_v17 = vmul.f32 %v1482_v15, %v1478_v8  ;;  %1339 = vmatprep.subr.mxu0 %v1501_v44  ;;  %v1237_v8 = vld [vmem:[%s1788_s1 + $0x3] ss:$0 sm:$0xff] }
 0x5f7   :  { %1327 = vmatmul.mubr.msk.f32.vlgmr.msra.gmra.mrb[6].mxu1 %vm349_vm3, %v371_v17  ;;  %1332 = vmatmul.mubr.msk.f32.vlgmr.msra.gmra.mrb[2].mxu0 %vm195_vm2, %v525_v18 }
 0x5f8   :  { %1335 = vmatpush3.xpose.msk.msra.mxu1 %vm195_vm2, %v605_v16  ;;  %1336 = vmatprep.mubr.msk.f32.mxu1 %vm1502_vm1, %v1501_v44 }
 0x5f9   :  { %1344 = vmatprep.subr.mxu1 %v1501_v44  ;;  %1341 = vmatprep.mubr.msk.f32.mxu0 %vm1502_vm1, %v1501_v44 }
 0x5fb   :  { %1337 = vmatmul.mubr.msk.f32.vlgmr.msra.gmra.mrb[8].mxu1 %vm195_vm2, %v603_v19 }
 0x5fc   :  { %1346 = vmatprep.mubr.msk.f32.mxu1 %vm1502_vm1, %v1501_v44 }
 0x6c6   :  { %v1646_v20 = vpop.f32.mrb[0].mxu0 }
 0x6c7   :  { %v1323_v21 = vpop.f32.mrb[1].mxu0  ;;  %v445_v2 = vadd.f32 %v1646_v20, %v1598_v48 }
 0x6ca   :  { %v1648_v22 = vpop.f32.mrb[6].mxu1  ;;  %v598_v23 = vpop.f32.mrb[2].mxu0 }
 0x6cb   :  { %v1328_v24 = vpop.f32.mrb[7].mxu1  ;;  %v1333_v25 = vpop.f32.mrb[3].mxu0  ;;  %v680_v26 = vsel %vm349_vm3, %v598_v23, -inf  ;;  %v521_v5 = vadd.f32 %v1648_v22, %v1602_v49 }
 0x6cc   :  { %681 = vmax.xlane.f32.xlu1 %v680_v26  ;;  %v999_v25 = vld [vmem:[%s1791_s4] sm:$0xff]  ;;  %v1000_v26 = vld [vmem:[%s1791_s4 + $0x8] sm:$0xff] }
 0x6ce   :  { %v676_v27 = vpop.f32.mrb[8].mxu1 }
 0x6cf   :  { %v1338_v28 = vpop.f32.mrb[9].mxu1  ;;  %v683_v29 = vsel %vm349_vm3, %v676_v27, -inf }
 0x6d0   :  { %684 = vmax.xlane.f32.xlu0 %v683_v29  ;;  %v1001_v28 = vld [vmem:[%s1791_s4 + $0x10] sm:$0xff]  ;;  %v1002_v29 = vld [vmem:[%s1791_s4 + $0x18] sm:$0xff] }
 0x759   :  { %v682_v30 = vpop.xlane.xlu1 %681 }
 0x75a   :  { %v686_v31 = vsub.f32 %v598_v23, %v682_v30  ;;  %v1426_v30 = vpack.c.bf16 %v1002_v29, %v1001_v28 }
 0x75c   :  { %v688_v32 = vmul.f32 1.442695, %v686_v31 }
 0x75d   :  { %v685_v33 = vpop.xlane.xlu0 %684 }
 0x75e   :  { %1483 = vpow2.f32 %v688_v32  ;;  %v687_v34 = vsub.f32 %v676_v27, %v685_v33  ;;  %v1422_v27 = vpack.c.bf16 %v1000_v26, %v999_v25 }
 0x760   :  { %v690_v35 = vmul.f32 1.442695, %v687_v34 }
 0x762   :  { %1485 = vpow2.f32 %v690_v35 }
 0x768   :  { %v1484_v36 = vpop.eup %1483 }
 0x769   :  { %v692_v37 = vsel %vm349_vm3, %v1484_v36, 0.0 }
 0x76a   :  { %693 = vadd.xlane.f32.xlu0 %v692_v37 }
 0x76c   :  { %v1486_v38 = vpop.eup %1485 }
 0x76d   :  { %v695_v39 = vsel %vm349_vm3, %v1486_v38, 0.0 }
 0x76e   :  { %696 = vadd.xlane.f32.xlu1 %v695_v39 }
 0x77f   :  { %781 = vrot.lane.b32.xlu1 %v1602_v49, %s1506_s18 }
 0x780   :  { %702 = vrot.lane.b32.xlu0 %v1598_v48, %s1506_s18 }
 0x783   :  { %705 = vrot.lane.b32.xlu1 %v1598_v48, %s1505_s17 }
 0x784   :  { %784 = vrot.lane.b32.xlu0 %v1602_v49, %s1505_s17 }
 0x7f7   :  { %v694_v40 = vpop.xlane.xlu0 %693 }
 0x7f8   :  { %1487 = vrcp.f32 %v694_v40 }
 0x7fb   :  { %v697_v41 = vpop.xlane.xlu1 %696  ;;  %v703_v42 = vpop.permute.xlu0 %702 }
 0x7fc   :  { %1489 = vrcp.f32 %v697_v41  ;;  %1340 = vmatpush3.msra.mxu0 %v703_v42  ;;  %v1241_v42 = vld [vmem:[%s1788_s1 + $0x5] ss:$0 sm:$0xff] }
 0x7ff   :  { %v782_v43 = vpop.permute.xlu1 %781  ;;  %v785_v60 = vpop.permute.xlu0 %784 }
 0x800   :  { %1345 = vmatpush3.msra.mxu1 %v782_v43 }
 0x801   :  { %1415 = vmatprep.subr.bf16.mxu1 %v1414_v52 }
 0x802   :  { %v1488_v44 = vpop.eup %1487 }
 0x803   :  { %v699_v45 = vmul.f32 %v1488_v44, %v1484_v36  ;;  %v706_v56 = vpop.permute.xlu1 %705 }
 0x805   :  { %1342 = vmatmul.mubr.msk.f32.vlgmr.msra.gmra.mrb[4].mxu0 %vm349_vm3, %v699_v45 }
 0x806   :  { %v1490_v46 = vpop.eup %1489 }
 0x807   :  { %v701_v47 = vmul.f32 %v1490_v46, %v1486_v38  ;;  %v1240_v38 = vld [vmem:[%s1788_s1 + $0x4] ss:$0 sm:$0xff] }
 0x809   :  { %1347 = vmatmul.mubr.msk.f32.vlgmr.msra.gmra.mrb[10].mxu1 %vm349_vm3, %v701_v47  ;;  %v1106_v47 = vld [vmem:[%s1792_s5] sm:$0xff] }
 0x80a   :  { %1417 = vmatpush3.bf16.msra.mxu1 %v1414_v52  ;;  %v1430_v51 = vpack.c.bf16 %v1107_v50, %v1106_v47  ;;  %v1108_v52 = vld [vmem:[%s1792_s5 + $0x10] sm:$0xff] }
 0x80b   :  { %1419 = vmatprep.subr.bf16.mxu1 %v1418_v55  ;;  %v1434_v54 = vpack.c.bf16 %v1109_v53, %v1108_v52 }
 0x80c   :  { %1431 = vmatprep.subr.bf16.mxu0 %v1430_v51 }
 0x80d   :  { %1433 = vmatpush3.bf16.msra.mxu0 %v1430_v51 }
 0x80e   :  { %1421 = vmatpush3.bf16.msra.mxu1 %v1418_v55  ;;  %1435 = vmatprep.subr.bf16.mxu0 %v1434_v54  ;;  %v1110_v55 = vld [vmem:[%s1792_s5 + $0x20] sm:$0xff] }
 0x80f   :  { %1423 = vmatprep.subr.bf16.mxu1 %v1422_v27 }
 0x811   :  { %1437 = vmatpush3.bf16.msra.mxu0 %v1434_v54 }
 0x8d8   :  { %v777_v57 = vpop.f32.mrb[4].mxu0 }
 0x8d9   :  { %v778_v58 = vadd.f32 %v777_v57, %v706_v56  ;;  %v1343_v59 = vpop.f32.mrb[5].mxu0  ;;  %v1111_v56 = vld [vmem:[%s1792_s5 + $0x28] sm:$0xff] }
 0x8da   :  { %v1438_v57 = vpack.c.bf16 %v1111_v56, %v1110_v55  ;;  %v1113_v59 = vld [vmem:[%s1792_s5 + $0x38] sm:$0xff] }
 0x8db   :  { %862 = vrot.lane.b32.xlu1 %v778_v58, %s1507_s26  ;;  %v1112_v58 = vld [vmem:[%s1792_s5 + $0x30] sm:$0xff] }
 0x8dc   :  { %v856_v61 = vpop.f32.mrb[10].mxu1  ;;  %1439 = vmatprep.subr.bf16.mxu0 %v1438_v57 }
 0x8dd   :  { %v857_v62 = vadd.f32 %v856_v61, %v785_v60  ;;  %v1348_v63 = vpop.f32.mrb[11].mxu1  ;;  %1441 = vmatpush3.bf16.msra.mxu0 %v1438_v57  ;;  %v1442_v60 = vpack.c.bf16 %v1113_v59, %v1112_v58  ;;  %v1114_v61 = vld [vmem:[%s1792_s5 + $0x40] sm:$0xff] }
 0x8de   :  { %v1116_v63 = vld [vmem:[%s1792_s5 + $0x50] sm:$0xff] }
 0x8df   :  { %864 = vrot.lane.b32.xlu0 %v857_v62, %s1507_s26  ;;  %1443 = vmatprep.subr.bf16.mxu0 %v1442_v60  ;;  %v1115_v62 = vld [vmem:[%s1792_s5 + $0x48] sm:$0xff] }
 0x8e1   :  { %1445 = vmatpush3.bf16.msra.mxu0 %v1442_v60 }
 0x94d   :  { %v863_v3 = vpop.permute.xlu1 %862 }
 0x94e   :  { %v868_v4 = vsel %vm195_vm2, %v445_v2, %v863_v3  ;;  %v1446_v2 = vpack.c.bf16 %v1115_v62, %v1114_v61  ;;  %v1117_v3 = vld [vmem:[%s1792_s5 + $0x58] sm:$0xff] }
 0x94f   :  { %1357 = vmatprep.mubr.msk.f32.mxu1 %vm41_vm0, %v868_v4  ;;  %v1450_v4 = vpack.c.bf16 %v1117_v3, %v1116_v63 }
 0x950   :  { %1447 = vmatprep.subr.bf16.mxu0 %v1446_v2 }
 0x951   :  { %v865_v6 = vpop.permute.xlu0 %864  ;;  %1449 = vmatpush3.bf16.msra.mxu0 %v1446_v2 }
 0x952   :  { %v869_v7 = vsel %vm195_vm2, %v521_v5, %v865_v6  ;;  %v1118_v5 = vld [vmem:[%s1792_s5 + $0x60] sm:$0xff]  ;;  %v1119_v6 = vld [vmem:[%s1792_s5 + $0x68] sm:$0xff]  ;;  %1451 = vmatprep.subr.bf16.mxu0 %v1450_v4 }
 0x953   :  { %1358 = vmatmul.mubr.msk.f32.vlgmr.msra.gmra.mrb[12].mxu1 %vm41_vm0, %v869_v7  ;;  %v1454_v7 = vpack.c.bf16 %v1119_v6, %v1118_v5 }
 0x954   :  { %1425 = vmatpush3.bf16.msra.mxu1 %v1422_v27 }
 0x955   :  { %1427 = vmatprep.subr.bf16.mxu1 %v1426_v30  ;;  %1453 = vmatpush3.bf16.msra.mxu0 %v1450_v4 }
 0x956   :  { %1455 = vmatprep.subr.bf16.mxu0 %v1454_v7 }
 0x958   :  { %1429 = vmatpush3.bf16.msra.mxu1 %v1426_v30 }
 0x959   :  { %1457 = vmatpush3.bf16.msra.mxu0 %v1454_v7 }
 0xa26   :  { %v1359_v9 = vpop.f32.mrb[12].mxu1 }
 0xa27   :  { %v956_v10 = vadd.f32 %v1359_v9, %v1237_v8  ;;  %v950_v48 = vpop.f32.mrb[13].mxu1  ;;  %v1121_v9 = vld [vmem:[%s1792_s5 + $0x78] sm:$0xff] }
 0xa28   :  { %v951_v11 = vadd.f32 %v1237_v8, %v950_v48  ;;  %v1120_v8 = vld [vmem:[%s1792_s5 + $0x70] sm:$0xff]  ;;  %v1242_v48 = vld [vmem:[%s1788_s1 + $0x6] ss:$0 sm:$0xff] }
 0xa29   :  { %v1686_v12 = vadd.f32 %v956_v10, %v1553_v1  ;;  %v1458_v10 = vpack.c.bf16 %v1121_v9, %v1120_v8 }
 0xa2a   :  { %v1689_v13 = vadd.f32 %v951_v11, %v1546_v0 }
 0xa2b   :  { %v964_v49 = vsel %vm41_vm0, %v1686_v12, 0.0  ;;  %1459 = vmatprep.subr.bf16.mxu0 %v1458_v10 }
 0xa2c   :  { %965 = vadd.xlane.f32.xlu0 %v964_v49  ;;  %v961_v14 = vsel %vm41_vm0, %v1689_v13, 0.0  ;;  %1461 = vmatpush3.bf16.msra.mxu0 %v1458_v10 }
 0xa2d   :  { %962 = vadd.xlane.f32.xlu1 %v961_v14 }
 0xab9   :  { %v966_v15 = vpop.xlane.xlu0 %965 }
 0xaba   :  { %v968_v16 = vmul.f32 0.03125, %v966_v15  ;;  %v963_v17 = vpop.xlane.xlu1 %962 }
 0xabb   :  { %v967_v18 = vmul.f32 0.03125, %v963_v17 }
 0xabc   :  { %v970_v19 = vsub.f32 %v1686_v12, %v968_v16 }
 0xabd   :  { %v969_v20 = vsub.f32 %v1689_v13, %v967_v18 }
 0xabe   :  { %v972_v21 = vmul.f32 %v970_v19, %v970_v19 }
 0xabf   :  { %v971_v22 = vmul.f32 %v969_v20, %v969_v20 }
 0xac0   :  { %v976_v23 = vsel %vm41_vm0, %v972_v21, 0.0 }
 0xac1   :  { %977 = vadd.xlane.f32.xlu1 %v976_v23  ;;  %v973_v24 = vsel %vm41_vm0, %v971_v22, 0.0 }
 0xac2   :  { %974 = vadd.xlane.f32.xlu0 %v973_v24 }
 0xb4e   :  { %v978_v31 = vpop.xlane.xlu1 %977 }
 0xb4f   :  { %v980_v32 = vmul.f32 0.03125, %v978_v31  ;;  %v975_v33 = vpop.xlane.xlu0 %974 }
 0xb50   :  { %v979_v34 = vmul.f32 0.03125, %v975_v33 }
 0xb51   :  { %v982_v35 = vadd.f32 1e-06, %v980_v32 }
 0xb52   :  { %v981_v36 = vadd.f32 1e-06, %v979_v34  ;;  %v1245_v34 = vld [vmem:[%s1788_s1 + $0x7] ss:$0 sm:$0xff] }
 0xb53   :  { %1491 = vrsqrt.f32 %v982_v35 }
 0xb54   :  { %1493 = vrsqrt.f32 %v981_v36 }
 0xb5d   :  { %v1492_v37 = vpop.eup %1491 }
 0xb5e   :  { %v1494_v39 = vpop.eup %1493  ;;  %v986_v40 = vmul.f32 %v1492_v37, %v970_v19 }
 0xb5f   :  { %v985_v41 = vmul.f32 %v1494_v39, %v969_v20 }
 0xb60   :  { %v992_v43 = vmul.f32 %v1240_v38, %v986_v40 }
 0xb61   :  { %v991_v44 = vmul.f32 %v1240_v38, %v985_v41 }
 0xb62   :  { %v998_v46 = vadd.f32 %v1241_v42, %v992_v43 }
 0xb63   :  { %v997_v45 = vadd.f32 %v1241_v42, %v991_v44 }
 0xb65   :  { %1368 = vmatprep.mubr.msk.f32.mxu1 %vm41_vm0, %v997_v45 }
 0xb66   :  { %1369 = vmatmul.mubr.msk.f32.vlgmr.msra.gmra.mrb[14].mxu1 %vm41_vm0, %v998_v46 }
 0xc39   :  { %v1370_v11 = vpop.f32.mrb[14].mxu1 }
 0xc3a   :  { %v1085_v49 = vadd.f32 %v1370_v11, %v1242_v48  ;;  %v1079_v14 = vpop.f32.mrb[15].mxu1 }
 0xc3b   :  { %v1080_v15 = vadd.f32 %v1242_v48, %v1079_v14 }
 0xc3c   :  { %v1089_v16 = vmul.f32 %v1085_v49, %v1085_v49 }
 0xc3d   :  { %v1088_v17 = vmul.f32 %v1080_v15, %v1080_v15 }
 0xc3e   :  { %v1091_v18 = vmul.f32 %v1089_v16, %v1085_v49 }
 0xc3f   :  { %v1090_v19 = vmul.f32 %v1088_v17, %v1080_v15 }
 0xc40   :  { %v1093_v20 = vmul.f32 0.044715, %v1091_v18 }
 0xc41   :  { %v1092_v21 = vmul.f32 0.044715, %v1090_v19 }
 0xc42   :  { %v1095_v22 = vadd.f32 %v1093_v20, %v1085_v49 }
 0xc43   :  { %v1094_v23 = vadd.f32 %v1092_v21, %v1080_v15 }
 0xc44   :  { %v1097_v24 = vmul.f32 0.7978846, %v1095_v22 }
 0xc45   :  { %v1096_v25 = vmul.f32 0.7978846, %v1094_v23 }
 0xc46   :  { %1495 = vtanh.f32 %v1097_v24 }
 0xc47   :  { %1497 = vtanh.f32 %v1096_v25 }
 0xc50   :  { %v1496_v26 = vpop.eup %1495 }
 0xc51   :  { %v1498_v27 = vpop.eup %1497  ;;  %v1101_v28 = vadd.f32 1.0, %v1496_v26 }
 0xc52   :  { %v1100_v29 = vadd.f32 1.0, %v1498_v27 }
 0xc53   :  { %v1103_v30 = vmul.f32 0.5, %v1101_v28 }
 0xc54   :  { %v1102_v31 = vmul.f32 0.5, %v1100_v29 }
 0xc55   :  { %v1105_v33 = vmul.f32 %v1103_v30, %v1085_v49 }
 0xc56   :  { %v1104_v32 = vmul.f32 %v1102_v31, %v1080_v15 }
 0xc58   :  { %1403 = vmatprep.mubr.f32.mxu0 %v1104_v32 }
 0xc59   :  { %1404 = vmatmul.mubr.f32.vlgmr.msra.gmra.mrb[6].mxu0 %v1105_v33 }
 0xd2c   :  { %v1405_v35 = vpop.f32.mrb[6].mxu0 }
 0xd2d   :  { %v1198_v36 = vadd.f32 %v1405_v35, %v1245_v34  ;;  %v1192_v37 = vpop.f32.mrb[7].mxu0 }
 0xd2e   :  { %v1193_v38 = vadd.f32 %v1245_v34, %v1192_v37 }
 0xd2f   :  { %1205 = vrot.lane.b32.xlu1 %v1198_v36, %s1500_s29 }
 0xd30   :  { %1203 = vrot.lane.b32.xlu0 %v1193_v38, %s1500_s29 }
 0xda1   :  { %v1206_v39 = vpop.permute.xlu1 %1205 }
 0xda2   :  { %v1210_v40 = vadd.f32 %v1206_v39, %v1553_v1  ;;  %v1204_v41 = vpop.permute.xlu0 %1203 }
 0xda3   :  { %v1209_v42 = vadd.f32 %v1204_v41, %v1546_v0 }
 0xda4   :  { %v1212_v43 = vsel %vm41_vm0, %v1686_v12, %v1210_v40 }
 0xda5   :  { %1215 = vst.msk [vmem:[%s1793_s6 + $0x8] sm:$0xff] %vm1213_vm4, %v1212_v43  ;;  %v1211_v44 = vsel %vm41_vm0, %v1689_v13, %v1209_v42 }
 0xda6   :  { %1214 = vst.msk [vmem:[%s1793_s6] sm:$0xff] %vm1213_vm4, %v1211_v44 }

</bundles_post_ra>
